<compile_context>
chip_gen: v7x
topology: tpu7x:2x2x1
jax: 0.10.0
libtpu: 0.0.40
codegen_flags: <defaults>
</compile_context>

<pallas_src>
import functools

import jax
import jax.numpy as jnp
from jax.experimental import pallas as pl
from jax.experimental.pallas import tpu as pltpu

HIDDEN_SIZE = 60
BPSK_CONSTELLATION_SIZE = 2

_LANE = 128
_SUBLANE = 8


def _round_up(x, m):
    return (x + m - 1) // m * m


def _hidden_bf16(rx_ref, w1_ref, w2_ref, b12_ref):
    """First two Linear+ReLU layers.  bf16 MXU operands, f32 accumulation/ReLU."""
    b = b12_ref[...]                                            # [2, hp] f32
    h1 = jnp.dot(rx_ref[...], w1_ref[...], preferred_element_type=jnp.float32)
    h1 = jnp.maximum(h1 + b[0:1, :], 0.0).astype(jnp.bfloat16)
    h2 = jnp.dot(h1, w2_ref[...], preferred_element_type=jnp.float32)
    h2 = jnp.maximum(h2 + b[1:2, :], 0.0)
    return h2.astype(jnp.bfloat16)                              # [tb, hp] bf16


def _train_kernel(rx_ref, w1_ref, w2_ref, w3_ref, b12_ref, b3_ref, out_ref, h2_ref):
    # Compute h2 once per batch tile (state-step 0), reuse it for every state tile.
    @pl.when(pl.program_id(1) == 0)
    def _():
        h2_ref[...] = _hidden_bf16(rx_ref, w1_ref, w2_ref, b12_ref)

    logits = jnp.dot(h2_ref[...], w3_ref[...], preferred_element_type=jnp.float32)
    out_ref[...] = (logits + b3_ref[...]).astype(out_ref.dtype)


def _val_kernel(rx_ref, w1_ref, w2_ref, w3_ref, b12_ref, b3_ref, out_ref,
                h2_ref, m_ref, idx_ref, *, n_states, n_ant):
    j = pl.program_id(1)

    @pl.when(j == 0)
    def _():
        h2_ref[...] = _hidden_bf16(rx_ref, w1_ref, w2_ref, b12_ref)
        m_ref[...] = jnp.full_like(m_ref, -3.0e38)
        idx_ref[...] = jnp.zeros_like(idx_ref)

    # Logits for this state tile only -> small, register-friendly temporaries.
    logits = jnp.dot(h2_ref[...], w3_ref[...], preferred_element_type=jnp.float32)
    logits = logits + b3_ref[...]
    tb, tn = logits.shape
    col = jax.lax.broadcasted_iota(jnp.int32, (tb, tn), 1) + j * tn   # global state idx
    masked = jnp.where(col < n_states, logits, jnp.float32(-3.0e38))  # mask padded states
    tile_max = jnp.max(masked, axis=1, keepdims=True)                 # [tb, 1]
    tile_arg = jnp.min(jnp.where(masked == tile_max, col, jnp.int32(2147483647)),
                       axis=1, keepdims=True)                          # first-index within tile
    # Online update: strict '>' keeps the *first* maximal index across state tiles.
    better = tile_max > m_ref[...]
    idx_ref[...] = jnp.where(better, tile_arg, idx_ref[...])
    m_ref[...] = jnp.where(better, tile_max, m_ref[...])

    @pl.when(j == pl.num_programs(1) - 1)
    def _():
        states = idx_ref[...]                                          # [tb, 1] int32
        out_lanes = out_ref.shape[1]
        ant = jax.lax.broadcasted_iota(jnp.int32, (tb, out_lanes), 1)
        shift = jnp.minimum(ant, 31)                                   # keep shifts defined
        bits = jnp.bitwise_and(jnp.right_shift(states, shift), 1)
        bits = jnp.where(ant < n_ant, bits, 0)                         # LSB-first bit decode
        out_ref[...] = bits.astype(out_ref.dtype)                      # lane-dense store


def _mlp_forward(rx, params, *, n_states, n_ant, phase):
    """Run the MLP (and optionally the fused val-phase decode) in one pallas_call."""
    w1, w2, w3, b12, b3 = params
    batch, n_user = rx.shape
    hp = w1.shape[1]                      # padded hidden width (128)
    nsp = w3.shape[1]                     # padded number of states (multiple of 128)

    is_val = (phase == 'val')
    cap_b = 64 if is_val else 512         # val: small tile -> argmax temps fit in vregs
    cap_s = 256 if is_val else 1024       # state-tile width (lane columns of W3 / logits)

    # Batch tile: multiple of 8 sublanes, capped, and split in two when possible so
    # the "parallel" batch axis gives both v7x TensorCores work.
    tb = min(cap_b, _round_up(batch, _SUBLANE))
    if batch > _SUBLANE:
        tb = min(tb, _round_up(pl.cdiv(batch, 2), _SUBLANE))
    pb = _round_up(batch, tb)
    tn = min(cap_s, nsp)                  # nsp is a power-of-two multiple of 128 -> divides
    grid = (pb // tb, nsp // tn)

    rx = rx.astype(jnp.bfloat16)
    if pb != batch:
        rx = jnp.pad(rx, ((0, pb - batch), (0, 0)))

    const2 = lambda i, j: (0, 0)
    in_specs = [
        pl.BlockSpec((tb, n_user), lambda i, j: (i, 0)),   # rx: batch-tiled
        pl.BlockSpec((n_user, hp), const2),                # W1 (block-resident, tiny)
        pl.BlockSpec((hp, hp), const2),                    # W2 (block-resident, tiny)
        pl.BlockSpec((hp, tn), lambda i, j: (0, j)),       # W3: state-tiled (pipelined)
        pl.BlockSpec((2, hp), const2),                     # b1|b2 packed (block-resident)
        pl.BlockSpec((1, tn), lambda i, j: (0, j)),        # b3: state-tiled
    ]
    cparams = pltpu.CompilerParams(
        dimension_semantics=("parallel", "arbitrary"),
        vmem_limit_bytes=32 * 1024 * 1024,   # safe on v5e/v6e/v7x; tiles keep usage ~5 MB
    )

    if is_val:
        out_lanes = _round_up(max(n_ant, 1), _LANE)        # lane-dense int32 output block
        kernel = functools.partial(_val_kernel, n_states=n_states, n_ant=n_ant)
        out = pl.pallas_call(
            kernel,
            out_shape=jax.ShapeDtypeStruct((pb, out_lanes), jnp.int32),
            grid=grid,
            in_specs=in_specs,
            out_specs=pl.BlockSpec((tb, out_lanes), lambda i, j: (i, 0)),
            scratch_shapes=[
                pltpu.VMEM((tb, hp), jnp.bfloat16),        # cached h2 activations
                pltpu.VMEM((tb, 1), jnp.float32),          # running row max
                pltpu.VMEM((tb, 1), jnp.int32),            # running row argmax
            ],
            compiler_params=cparams,
        )(rx, w1, w2, w3, b12, b3)
        return out[:batch, :n_ant]

    out = pl.pallas_call(
        _train_kernel,
        out_shape=jax.ShapeDtypeStruct((pb, nsp), jnp.float32),
        grid=grid,
        in_specs=in_specs,
        out_specs=pl.BlockSpec((tb, tn), lambda i, j: (i, j)),
        scratch_shapes=[pltpu.VMEM((tb, hp), jnp.bfloat16)],
        compiler_params=cparams,
    )(rx, w1, w2, w3, b12, b3)
    # Padded state columns have exactly-zero logits; slice them off to preserve the
    # original module's [batch, n_states] output contract (skip when nothing to slice).
    if pb != batch or nsp != n_states:
        out = out[:batch, :n_states]
    return out


def calculate_symbols_from_states(n_ant, states):
    """Pure-JAX reference: decompose integer state index into per-antenna bits (0/1)."""
    mask = (2 ** jnp.arange(n_ant, dtype=jnp.int32))[None, :]
    return ((states[:, None].astype(jnp.int32) & mask) != 0).astype(jnp.int32)


class DNNDetector:
    """JAX/Pallas re-implementation of the PyTorch DNNDetector forward pass."""

    def __init__(self, n_user, n_ant, key):
        self.n_user = n_user
        self.n_ant = n_ant
        self.n_states = BPSK_CONSTELLATION_SIZE ** n_ant
        self._hp = _round_up(HIDDEN_SIZE, _LANE)        # hidden padded to 128 lanes
        self._nsp = _round_up(self.n_states, _LANE)     # states padded to 128 lanes
        self.params = self._init_params(key)

    def _init_params(self, key):
        # Deterministic init mimicking nn.Linear default: U(-1/sqrt(fan_in), +1/sqrt(fan_in)),
        # stored as [in, out] (== torch weight.T), zero-padded to lane-aligned shapes.
        dims = [(self.n_user, HIDDEN_SIZE),
                (HIDDEN_SIZE, HIDDEN_SIZE),
                (HIDDEN_SIZE, self.n_states)]
        ws, bs = [], []
        for fan_in, fan_out in dims:
            key, kw, kb = jax.random.split(key, 3)
            bound = 1.0 / float(fan_in) ** 0.5
            ws.append(jax.random.uniform(kw, (fan_in, fan_out), jnp.float32, -bound, bound))
            bs.append(jax.random.uniform(kb, (fan_out,), jnp.float32, -bound, bound))
        hp, nsp, ns = self._hp, self._nsp, self.n_states
        # Weights (MXU operands) are stored padded + bf16; biases stay f32.
        w1 = jnp.pad(ws[0], ((0, 0), (0, hp - HIDDEN_SIZE))).astype(jnp.bfloat16)
        w2 = jnp.pad(ws[1], ((0, hp - HIDDEN_SIZE), (0, hp - HIDDEN_SIZE))).astype(jnp.bfloat16)
        w3 = jnp.pad(ws[2], ((0, hp - HIDDEN_SIZE), (0, nsp - ns))).astype(jnp.bfloat16)
        b12 = jnp.stack([jnp.pad(bs[0], (0, hp - HIDDEN_SIZE)),
                         jnp.pad(bs[1], (0, hp - HIDDEN_SIZE))], axis=0)   # [2, hp] f32
        b3 = jnp.pad(bs[2], (0, nsp - ns))[None, :]                        # [1, nsp] f32
        return (w1, w2, w3, b12, b3)

    def forward(self, rx, phase):
        out = _mlp_forward(rx, self.params, n_states=self.n_states,
                           n_ant=self.n_ant, phase=phase)
        if phase == 'val':
            int_dtype = jnp.int64 if jax.config.jax_enable_x64 else jnp.int32
            return out.astype(int_dtype)
        return out


if __name__ == "__main__":
    key = jax.random.PRNGKey(0)
    key, k_in = jax.random.split(key)

    n_user = 4
    n_ant = 4
    batch = 8

    detector = DNNDetector(n_user, n_ant, key)
    rx = jax.random.normal(k_in, (batch, n_user), jnp.float32)

    # 'train' phase: raw logits [batch, 2**n_ant]
    logits = detector.forward(rx, phase='train')
    jax.block_until_ready(logits)
    assert logits.shape == (batch, BPSK_CONSTELLATION_SIZE ** n_ant)

    # Pure-JAX reference mimicking the kernel numerics (bf16 operands, f32 accumulation).
    w1, w2, w3, b12, b3 = detector.params
    f32 = jnp.float32
    hi = jax.lax.Precision.HIGHEST
    rxb = rx.astype(jnp.bfloat16).astype(f32)
    h1 = jnp.maximum(jnp.dot(rxb, w1.astype(f32), precision=hi) + b12[0], 0.0)
    h1 = h1.astype(jnp.bfloat16).astype(f32)
    h2 = jnp.maximum(jnp.dot(h1, w2.astype(f32), precision=hi) + b12[1], 0.0)
    h2 = h2.astype(jnp.bfloat16).astype(f32)
    ref_logits = (jnp.dot(h2, w3.astype(f32), precision=hi) + b3[0])[:, :detector.n_states]
    assert jnp.allclose(logits, ref_logits, rtol=1e-2, atol=1e-2), "train logits mismatch"

    # 'val' phase: fused online argmax + bit-decode -> per-antenna symbol bits [batch, n_ant].
    # Reference argmax is taken over the kernel's own logits so bf16 numerics match exactly.
    words = detector.forward(rx, phase='val')
    jax.block_until_ready(words)
    assert words.shape == (batch, n_ant)
    ref_words = calculate_symbols_from_states(n_ant, jnp.argmax(logits, axis=1))
    assert jnp.array_equal(words.astype(jnp.int32), ref_words), "val words mismatch"

    print("KERNEL_OK")
</pallas_src>

<mosaic_0001>
module attributes {stable_mosaic.version = 11 : i64} {
  func.func @_train_kernel(%arg0: i32, %arg1: i32, %arg2: memref<8x4xbf16, #tpu.memory_space<vmem>>, %arg3: memref<4x128xbf16, #tpu.memory_space<vmem>>, %arg4: memref<128x128xbf16, #tpu.memory_space<vmem>>, %arg5: memref<128x128xbf16, #tpu.memory_space<vmem>>, %arg6: memref<2x128xf32, #tpu.memory_space<vmem>>, %arg7: memref<1x128xf32, #tpu.memory_space<vmem>>, %arg8: memref<8x128xf32, #tpu.memory_space<vmem>>, %arg9: memref<8x128xbf16, #tpu.memory_space<vmem>>) attributes {dimension_semantics = [#tpu.dimension_semantics<parallel>, #tpu.dimension_semantics<arbitrary>], iteration_bounds = array<i64: 1, 1>, scalar_prefetch = 0 : i64, scratch_operands = 1 : i64, tpu.core_type = #tpu.core_type<tc>, window_params = [{transform_indices = @transform_0, window_bounds = array<i64: 8, 4>}, {pipeline_mode = #tpu.pipeline_mode<synchronous>, transform_indices = @transform_1, window_bounds = array<i64: 4, 128>}, {pipeline_mode = #tpu.pipeline_mode<synchronous>, transform_indices = @transform_2, window_bounds = array<i64: 128, 128>}, {transform_indices = @transform_3, window_bounds = array<i64: 128, 128>}, {pipeline_mode = #tpu.pipeline_mode<synchronous>, transform_indices = @transform_4, window_bounds = array<i64: 2, 128>}, {transform_indices = @transform_5, window_bounds = array<i64: 1, 128>}, {transform_indices = @transform_6, window_bounds = array<i64: 8, 128>}]} {
    %c0_i32 = arith.constant 0 : i32
    %0 = arith.cmpi eq, %arg1, %c0_i32 : i32
    %1 = arith.extui %0 : i1 to i32
    %c0_i32_0 = arith.constant 0 : i32
    %2 = arith.cmpi ne, %1, %c0_i32_0 : i32
    scf.if %2 {
      %c0_8 = arith.constant 0 : index
      %c0_9 = arith.constant 0 : index
      %10 = vector.load %arg6[%c0_8, %c0_9] : memref<2x128xf32, #tpu.memory_space<vmem>>, vector<2x128xf32>
      %c0_10 = arith.constant 0 : index
      %c0_11 = arith.constant 0 : index
      %11 = vector.load %arg2[%c0_10, %c0_11] : memref<8x4xbf16, #tpu.memory_space<vmem>>, vector<8x4xbf16>
      %c0_12 = arith.constant 0 : index
      %c0_13 = arith.constant 0 : index
      %12 = vector.load %arg3[%c0_12, %c0_13] : memref<4x128xbf16, #tpu.memory_space<vmem>>, vector<4x128xbf16>
      %cst_14 = arith.constant dense<0.000000e+00> : vector<8x128xf32>
      %13 = tpu.matmul %11, %12, %cst_14 {dimension_numbers = #tpu.dot_dimension_numbers<[1], [0], [0], [1], [0, 0, 1, 1], [], []>} : vector<8x4xbf16>, vector<4x128xbf16>, vector<8x128xf32> -> vector<8x128xf32>
      %14 = vector.extract_strided_slice %10 {offsets = [0, 0], sizes = [1, 128], strides = [1, 1]} : vector<2x128xf32> to vector<1x128xf32>
      %15 = vector.broadcast %14 : vector<1x128xf32> to vector<8x128xf32>
      %16 = arith.addf %13, %15 : vector<8x128xf32>
      %cst_15 = arith.constant 0.000000e+00 : f32
      %17 = vector.broadcast %cst_15 : f32 to vector<8x128xf32>
      %18 = arith.maximumf %16, %17 : vector<8x128xf32>
      %19 = arith.truncf %18 : vector<8x128xf32> to vector<8x128xbf16>
      %c0_16 = arith.constant 0 : index
      %c0_17 = arith.constant 0 : index
      %20 = vector.load %arg4[%c0_16, %c0_17] : memref<128x128xbf16, #tpu.memory_space<vmem>>, vector<128x128xbf16>
      %cst_18 = arith.constant dense<0.000000e+00> : vector<8x128xf32>
      %21 = tpu.matmul %19, %20, %cst_18 {dimension_numbers = #tpu.dot_dimension_numbers<[1], [0], [0], [1], [0, 0, 1, 1], [], []>} : vector<8x128xbf16>, vector<128x128xbf16>, vector<8x128xf32> -> vector<8x128xf32>
      %22 = vector.extract_strided_slice %10 {offsets = [1, 0], sizes = [1, 128], strides = [1, 1]} : vector<2x128xf32> to vector<1x128xf32>
      %23 = vector.broadcast %22 : vector<1x128xf32> to vector<8x128xf32>
      %24 = arith.addf %21, %23 : vector<8x128xf32>
      %cst_19 = arith.constant 0.000000e+00 : f32
      %25 = vector.broadcast %cst_19 : f32 to vector<8x128xf32>
      %26 = arith.maximumf %24, %25 : vector<8x128xf32>
      %27 = arith.truncf %26 : vector<8x128xf32> to vector<8x128xbf16>
      %c0_20 = arith.constant 0 : index
      %c0_21 = arith.constant 0 : index
      %28 = vector.load %arg9[%c0_20, %c0_21] : memref<8x128xbf16, #tpu.memory_space<vmem>>, vector<8x128xbf16>
      tpu.vector_store %arg9[%c0_20, %c0_21], %27 {strides = array<i32>} : memref<8x128xbf16, #tpu.memory_space<vmem>>, vector<8x128xbf16>,
    } else {
    }
    %c0 = arith.constant 0 : index
    %c0_1 = arith.constant 0 : index
    %3 = vector.load %arg9[%c0, %c0_1] : memref<8x128xbf16, #tpu.memory_space<vmem>>, vector<8x128xbf16>
    %c0_2 = arith.constant 0 : index
    %c0_3 = arith.constant 0 : index
    %4 = vector.load %arg5[%c0_2, %c0_3] : memref<128x128xbf16, #tpu.memory_space<vmem>>, vector<128x128xbf16>
    %cst = arith.constant dense<0.000000e+00> : vector<8x128xf32>
    %5 = tpu.matmul %3, %4, %cst {dimension_numbers = #tpu.dot_dimension_numbers<[1], [0], [0], [1], [0, 0, 1, 1], [], []>} : vector<8x128xbf16>, vector<128x128xbf16>, vector<8x128xf32> -> vector<8x128xf32>
    %c0_4 = arith.constant 0 : index
    %c0_5 = arith.constant 0 : index
    %6 = vector.load %arg7[%c0_4, %c0_5] : memref<1x128xf32, #tpu.memory_space<vmem>>, vector<1x128xf32>
    %7 = vector.broadcast %6 : vector<1x128xf32> to vector<8x128xf32>
    %8 = arith.addf %5, %7 : vector<8x128xf32>
    %c0_6 = arith.constant 0 : index
    %c0_7 = arith.constant 0 : index
    %9 = vector.load %arg8[%c0_6, %c0_7] : memref<8x128xf32, #tpu.memory_space<vmem>>, vector<8x128xf32>
    tpu.vector_store %arg8[%c0_6, %c0_7], %8 {strides = array<i32>} : memref<8x128xf32, #tpu.memory_space<vmem>>, vector<8x128xf32>,
    return
  }
  func.func @transform_0(%arg0: i32, %arg1: i32) -> (i32, i32) {
    %c0_i32 = arith.constant 0 : i32
    %c0_i32_0 = arith.constant 0 : i32
    return %arg0, %c0_i32 : i32, i32
  }
  func.func @transform_1(%arg0: i32, %arg1: i32) -> (i32, i32) {
    %c0_i32 = arith.constant 0 : i32
    %c0_i32_0 = arith.constant 0 : i32
    %c0_i32_1 = arith.constant 0 : i32
    return %c0_i32, %c0_i32_0 : i32, i32
  }
  func.func @transform_2(%arg0: i32, %arg1: i32) -> (i32, i32) {
    %c0_i32 = arith.constant 0 : i32
    %c0_i32_0 = arith.constant 0 : i32
    %c0_i32_1 = arith.constant 0 : i32
    return %c0_i32, %c0_i32_0 : i32, i32
  }
  func.func @transform_3(%arg0: i32, %arg1: i32) -> (i32, i32) {
    %c0_i32 = arith.constant 0 : i32
    %c0_i32_0 = arith.constant 0 : i32
    return %c0_i32, %arg1 : i32, i32
  }
  func.func @transform_4(%arg0: i32, %arg1: i32) -> (i32, i32) {
    %c0_i32 = arith.constant 0 : i32
    %c0_i32_0 = arith.constant 0 : i32
    %c0_i32_1 = arith.constant 0 : i32
    return %c0_i32, %c0_i32_0 : i32, i32
  }
  func.func @transform_5(%arg0: i32, %arg1: i32) -> (i32, i32) {
    %c0_i32 = arith.constant 0 : i32
    %c0_i32_0 = arith.constant 0 : i32
    return %c0_i32, %arg1 : i32, i32
  }
  func.func @transform_6(%arg0: i32, %arg1: i32) -> (i32, i32) {
    %c0_i32 = arith.constant 0 : i32
    return %arg0, %arg1 : i32, i32
  }
}

</mosaic_0001>

<bundles_post_ra>
// kernel: tpu_custom_call.1
= control target key start
LH: loop header
LB: loop body
LE: loop exit
PB: predicated region body
PF: predicated region fallthrough
CT: control target
= control target key end

     0   :  { %11 = vsyncpa [#allocation4], 0  ;;  %s646_s0 = inlined_call_operand.vmem [shape: bf16[8,4], index: 0, kind: input, shape index: {}]   ;;  %s647_s1 = inlined_call_operand.vmem [shape: bf16[4,128], index: 1, kind: input, shape index: {}]   ;;  %s648_s2 = inlined_call_operand.hbm [shape: bf16[128,128], index: 2, kind: input, shape index: {}]   ;;  %s649_s3 = inlined_call_operand.hbm [shape: bf16[128,128], index: 3, kind: input, shape index: {}]   ;;  %s650_s4 = inlined_call_operand.vmem [shape: f32[2,128], index: 4, kind: input, shape index: {}]   ;;  %s651_s5 = inlined_call_operand.vmem [shape: f32[1,128], index: 5, kind: input, shape index: {}]   ;;  %s652_s6 = inlined_call_operand.hbm [shape: f32[8,128], index: 6, kind: output, shape index: {}]  }
   0x1   :  { %12 = vsyncpa [#allocation7], 0 }
   0x2   :  { %13 = vsyncpa [#allocation5], 0  ;;  %s533_s21 = smov [#allocation3]   ;;  %s461_s25 = scalar_lea.hbm %s648_s2, 1024 }
   0x3   :  { %s23_s22 = sshll.u32 %s533_s21, 4  ;;  %p462_p0 = scmp.ne.s32.totalorder %s648_s2, %s461_s25  ;;  %s24_s22 = int_to_ptr.vmem [resolvable:$true] %s23_s22 }
   0x4   :  { %p465_p1 = scmp.lt.u32.totalorder %s461_s25, %s648_s2 }
   0x6   :  { %p467_p2 = pnand %p465_p1, %p462_p0 }
   0x8   :  { %470 = shalt.err (!%p467_p2)
}
   0x9   :  { %s471_s30 = scalar_lea.vmem %s24_s22, 1024  ;;  %p476_p4 = scmp.lt.s32.totalorder %s24_s22, %s24_s22 }
   0xa   :  { %p472_p3 = scmp.ne.s32.totalorder %s24_s22, %s471_s30  ;;  %p477_p5 = scmp.lt.s32.totalorder %s471_s30, %s471_s30 }
   0xc   :  { %p478_p6 = por %p477_p5, %p476_p4 }
   0xe   :  { %p479_p7 = pnand %p478_p6, %p472_p3 }
  0x10   :  { %482 = shalt.err (!%p479_p7)
}
  0x11   :  { %s534_s7 = smov 64   ;;  %s535_s8 = smov 4  }
  0x12   :  { %29 = dma.hbm_to_vmem [thread:$0]  %s648_s2, 1024, %s24_s22, [#allocation4], %s534_s7, %s534_s7, %s535_s8  }
  0x13   :  { %s536_s11 = smov [#allocation6]   ;;  %s483_s15 = scalar_lea.hbm %s649_s3, 1024 }
  0x14   :  { %s35_s12 = sshll.u32 %s536_s11, 4  ;;  %p484_p8 = scmp.ne.s32.totalorder %s649_s3, %s483_s15  ;;  %s36_s12 = int_to_ptr.vmem [resolvable:$true] %s35_s12 }
  0x15   :  { %p487_p9 = scmp.lt.u32.totalorder %s483_s15, %s649_s3 }
  0x17   :  { %p489_p10 = pnand %p487_p9, %p484_p8 }
  0x19   :  { %492 = shalt.err (!%p489_p10)
}
  0x1a   :  { %s493_s20 = scalar_lea.vmem %s36_s12, 1024  ;;  %p498_p12 = scmp.lt.s32.totalorder %s36_s12, %s36_s12 }
  0x1b   :  { %p494_p11 = scmp.ne.s32.totalorder %s36_s12, %s493_s20  ;;  %p499_p13 = scmp.lt.s32.totalorder %s493_s20, %s493_s20 }
  0x1d   :  { %p500_p0 = por %p499_p13, %p498_p12 }
  0x1f   :  { %p501_p1 = pnand %p500_p0, %p494_p11 }
  0x21   :  { %504 = shalt.err (!%p501_p1)
}
  0x22   :  { %41 = dma.hbm_to_vmem [thread:$0]  %s649_s3, 1024, %s36_s12, [#allocation7], %s534_s7, %s534_s7, %s535_s8  }
  0x23   :  { %527 = dma.done.wait [#allocation4], 1024  }
  0x24   :  { %528 = vsyncadd [#allocation4], 4294966272 }
  0x25   :  { %529 = dma.done.wait [#allocation7], 1024  }
  0x26   :  { %530 = vsyncadd [#allocation7], 4294966272  ;;  %v537_v0 = vmov 0.0   ;;  %vm538_vm0 = vmmov 0   ;;  %vm68_vm1 = vcmask 1041408   ;;  %vm64_vm2 = vcmask 31744  }
  0x27   :  { %392 = vmatprep.subr.bf16.mxu0 %v537_v0  ;;  %394 = vmatprep.mubr.msk.bf16.mxu0 %vm538_vm0, %v537_v0  ;;  %v59_v1 = vld [vmem:[%s647_s1] sm:$0x3]  ;;  %v445_v3 = vld [vmem:[#allocation3] sm:$0xff]   ;;  %v446_v5 = vld [vmem:[#allocation3 + $0x8] sm:$0xff]   ;;  %v60_v16 = vlaneseq  ;;  %s539_s26 = smov [#allocation8]  }
  0x28   :  { %398 = vmatprep.subr.bf16.mxu1 %v537_v0  ;;  %414 = vmatprep.mubr.msk.bf16.mxu1 %vm538_vm0, %v537_v0  ;;  %v70_v2 = vsel %vm68_vm1, %v59_v1, 0  ;;  %v58_v4 = vld [vmem:[%s646_s0] sm:$0xf]  ;;  %v447_v6 = vld [vmem:[#allocation3 + $0x10] sm:$0xff]   ;;  %v449_v8 = vld [vmem:[#allocation3 + $0x20] sm:$0xff]   ;;  %s344_s27 = sshll.u32 %s539_s26, 4  ;;  %s345_s27 = int_to_ptr.vmem [resolvable:$true] %s344_s27 }
  0x29   :  { %393 = vmatpush3.bf16.msra.mxu0 %v70_v2  ;;  %399 = vmatpush3.bf16.msra.mxu1 %v445_v3  ;;  %v448_v7 = vld [vmem:[#allocation3 + $0x18] sm:$0xff]   ;;  %v450_v9 = vld [vmem:[#allocation3 + $0x28] sm:$0xff]   ;;  %v451_v10 = vld [vmem:[#allocation3 + $0x30] sm:$0xff]   ;;  %v61_v17 = vshrl.u32 %v60_v16, 7  ;;  %s505_s28 = scalar_lea.vmem %s345_s27, 128  ;;  %p510_p3 = scmp.lt.s32.totalorder %s345_s27, %s345_s27 }
  0x2a   :  { %418 = vmatprep.subr.bf16.mxu0 %v537_v0  ;;  %400 = vmatprep.subr.bf16.mxu1 %v537_v0  ;;  %v452_v11 = vld [vmem:[#allocation3 + $0x38] sm:$0xff]   ;;  %v453_v12 = vld [vmem:[#allocation6] sm:$0xff]   ;;  %v454_v13 = vld [vmem:[#allocation6 + $0x8] sm:$0xff]   ;;  %p506_p2 = scmp.ne.s32.totalorder %s345_s27, %s505_s28  ;;  %p511_p4 = scmp.lt.s32.totalorder %s505_s28, %s505_s28 }
  0x2b   :  { %v455_v14 = vld [vmem:[#allocation6 + $0x10] sm:$0xff]   ;;  %v456_v15 = vld [vmem:[#allocation6 + $0x18] sm:$0xff]   ;;  %v62_v18 = vsub.s32 0, %v61_v17  ;;  %v457_v28 = vld [vmem:[#allocation6 + $0x20] sm:$0xff]   ;;  %v132_v32 = vsub.s32 1, %v61_v17 }
  0x2c   :  { %395 = vmatmul.mubr.msk.bf16.vlgmr.msra.gmra.mrb[0].mxu0 %vm64_vm2, %v58_v4  ;;  %v57_v19 = vld [vmem:[%s650_s4] sm:$0x3]  ;;  %v458_v29 = vld [vmem:[#allocation6 + $0x28] sm:$0xff]   ;;  %v459_v30 = vld [vmem:[#allocation6 + $0x30] sm:$0xff]   ;;  %p512_p5 = por %p511_p4, %p510_p3 }
  0x2d   :  { %434 = vmatprep.mubr.msk.bf16.mxu0 %vm538_vm0, %v537_v0  ;;  %401 = vmatpush3.bf16.msra.mxu1 %v446_v5  ;;  %v63_v20 = vrot.slane %v57_v19, %v62_v18  ;;  %v460_v31 = vld [vmem:[#allocation6 + $0x38] sm:$0xff]   ;;  %v133_v33 = vrot.slane %v57_v19, %v132_v32 }
  0x2e   :  { %402 = vmatprep.subr.bf16.mxu1 %v537_v0  ;;  %419 = vmatpush3.bf16.msra.mxu0 %v453_v12  ;;  %v363_v42 = vld [vmem:[%s651_s5] ss:$0 sm:$0xff]  ;;  %p513_p6 = pnand %p512_p5, %p506_p2 }
  0x2f   :  { %420 = vmatprep.subr.bf16.mxu0 %v537_v0 }
  0x31   :  { %403 = vmatpush3.bf16.msra.mxu1 %v447_v6 }
  0x32   :  { %404 = vmatprep.subr.bf16.mxu1 %v537_v0  ;;  %421 = vmatpush3.bf16.msra.mxu0 %v454_v13 }
  0x33   :  { %422 = vmatprep.subr.bf16.mxu0 %v537_v0 }
  0x35   :  { %405 = vmatpush3.bf16.msra.mxu1 %v448_v7 }
  0x36   :  { %406 = vmatprep.subr.bf16.mxu1 %v537_v0  ;;  %423 = vmatpush3.bf16.msra.mxu0 %v455_v14 }
  0x37   :  { %424 = vmatprep.subr.bf16.mxu0 %v537_v0 }
  0x39   :  { %407 = vmatpush3.bf16.msra.mxu1 %v449_v8 }
  0x3a   :  { %408 = vmatprep.subr.bf16.mxu1 %v537_v0  ;;  %425 = vmatpush3.bf16.msra.mxu0 %v456_v15 }
  0x3b   :  { %426 = vmatprep.subr.bf16.mxu0 %v537_v0 }
  0x3d   :  { %409 = vmatpush3.bf16.msra.mxu1 %v450_v9 }
  0x3e   :  { %410 = vmatprep.subr.bf16.mxu1 %v537_v0  ;;  %427 = vmatpush3.bf16.msra.mxu0 %v457_v28 }
  0x3f   :  { %428 = vmatprep.subr.bf16.mxu0 %v537_v0 }
  0x41   :  { %411 = vmatpush3.bf16.msra.mxu1 %v451_v10 }
  0x42   :  { %412 = vmatprep.subr.bf16.mxu1 %v537_v0  ;;  %429 = vmatpush3.bf16.msra.mxu0 %v458_v29 }
  0x43   :  { %430 = vmatprep.subr.bf16.mxu0 %v537_v0 }
  0x45   :  { %413 = vmatpush3.bf16.msra.mxu1 %v452_v11 }
  0x46   :  { %431 = vmatpush3.bf16.msra.mxu0 %v459_v30 }
  0x47   :  { %432 = vmatprep.subr.bf16.mxu0 %v537_v0 }
  0x4a   :  { %433 = vmatpush3.bf16.msra.mxu0 %v460_v31 }
  0xff   :  { %v106_v21 = vpop.f32.mrb[0].mxu0 }
 0x100   :  { %v107_v22 = vadd.f32 %v106_v21, %v63_v20  ;;  %v396_v23 = vpop.f32.mrb[1].mxu0 }
 0x101   :  { %v109_v24 = vpop.f32.mrb[2].mxu0 }
 0x102   :  { %v112_v25 = vmax.f32 %v107_v22, 0.0  ;;  %v397_v26 = vpop.f32.mrb[3].mxu0 }
 0x104   :  { %v113_v27 = vpack.c.bf16 %v112_v25, %v112_v25 }
 0x106   :  { %415 = vmatmul.mubr.bf16.vlgmr.msra.gmra.mrb[0].mxu1 %v113_v27 }
 0x1d9   :  { %v216_v34 = vpop.f32.mrb[0].mxu1 }
 0x1da   :  { %v217_v35 = vadd.f32 %v216_v34, %v133_v33  ;;  %v416_v36 = vpop.f32.mrb[1].mxu1 }
 0x1db   :  { %v219_v37 = vpop.f32.mrb[2].mxu1 }
 0x1dc   :  { %v222_v38 = vmax.f32 %v217_v35, 0.0  ;;  %v417_v39 = vpop.f32.mrb[3].mxu1 }
 0x1de   :  { %v223_v40 = vpack.c.bf16 %v222_v38, %v222_v38 }
 0x1e0   :  { %224 = vst [vmem:[#allocation2] sm:$0xf] %v223_v40 }
 0x1e7   :  { %v225_v41 = vld [vmem:[#allocation2] sm:$0xf] }
 0x1e8   :  { %435 = vmatmul.mubr.bf16.vlgmr.msra.gmra.mrb[4].mxu0 %v225_v41 }
 0x2bb   :  { %v331_v43 = vpop.f32.mrb[4].mxu0 }
 0x2bc   :  { %v332_v44 = vadd.f32 %v363_v42, %v331_v43  ;;  %v436_v45 = vpop.f32.mrb[5].mxu0 }
 0x2bd   :  { %v334_v46 = vpop.f32.mrb[6].mxu0 }
 0x2be   :  { %337 = vst [vmem:[#allocation8] sm:$0xff] %v332_v44  ;;  %v437_v47 = vpop.f32.mrb[7].mxu0 }
 0x2bf   :  { %516 = shalt.err (!%p513_p6)
}
 0x2c0   :  { %s517_s5 = scalar_lea.hbm %s652_s6, 128 }
 0x2c1   :  { %p518_p7 = scmp.ne.s32.totalorder %s652_s6, %s517_s5  ;;  %p521_p8 = scmp.lt.u32.totalorder %s517_s5, %s652_s6 }
 0x2c3   :  { %p523_p9 = pnand %p521_p8, %p518_p7 }
 0x2c5   :  { %526 = shalt.err (!%p523_p9)
}
 0x2c6   :  { %347 = dma.vmem_to_hbm [thread:$0]  %s345_s27, 128, %s652_s6, [#allocation5]  }
 0x2c7   :  { %531 = dma.done.wait [#allocation5], 128  }
 0x2c8   :  { %532 = vsyncadd [#allocation5], 4294967168 }
 0x2c9   :  { %351 = vsyncpa [#allocation4], 1 }
 0x2ca   :  { %352 = vsyncpa [#allocation7], 1 }
 0x2cb   :  { %353 = vsyncpa [#allocation5], 1 }

</bundles_post_ra>
